<compile_context>
chip_gen: v5e
topology: v5e:2x2
jax: 0.10.0
libtpu: 0.0.40
codegen_flags: <defaults>
</compile_context>

<pallas_src>
import math

import jax
import jax.numpy as jnp
import numpy as np
from jax.experimental import pallas as pl
from jax.experimental.pallas import tpu as pltpu


def _cam_kernel(x_ref, w1t_ref, b1_ref, w2t_ref, b2x2_ref, o_ref):
    """Processes Nb images per grid step.

    x_ref:    (1, Nb, C, HW) input, HW on the 128-lane axis (any float dtype)
    w1t_ref:  (C, mid)   first Linear weight, pre-transposed to (in, out)
    b1_ref:   (1, mid)   first Linear bias (row)
    w2t_ref:  (mid, C)   second Linear weight, pre-transposed to (in, out)
    b2x2_ref: (1, C)     2 * second Linear bias (row; branch-fused)
    o_ref:    (1, Nb, C) sigmoid channel-attention weights (lane-dense rows)
    """
    nb = x_ref.shape[1]
    hw = x_ref.shape[3]

    # Upcast AFTER the load so a bf16 input halves the HBM->VMEM DMA; the mean
    # is always accumulated in f32.
    x = x_ref[0].astype(jnp.float32)                       # (Nb, C, HW)

    # Global average / max pool over HW: single lane (XLU) reductions per image.
    avg = jnp.sum(x, axis=2) * (1.0 / hw)                  # (Nb, C)
    mx = jnp.max(x, axis=2)                                # (Nb, C)

    # First shared-MLP layer: ONE GEMM for all 2*Nb pooled vectors.
    pooled = jnp.concatenate([avg, mx], axis=0)            # (2*Nb, C)
    h = jnp.dot(pooled, w1t_ref[...], preferred_element_type=jnp.float32)
    h = jnp.maximum(h + b1_ref[...], 0.0)                  # (2*Nb, mid)

    # Fuse the avg/max branches before the second layer:
    #   W2 @ (h_avg + h_max) + 2*b2 == (W2 @ h_avg + b2) + (W2 @ h_max + b2)
    h_sum = h[:nb] + h[nb:]                                # (Nb, mid)
    o = jnp.dot(h_sum, w2t_ref[...], preferred_element_type=jnp.float32)
    o = o + b2x2_ref[...]                                  # (Nb, C)

    # Lane-dense (Nb, C) store of the sigmoid attention weights.
    o_ref[0] = jax.nn.sigmoid(o).astype(o_ref.dtype)


def _pick_nb(n, c, hw, itemsize):
    """Images per grid step: fit a conservative VMEM budget, keep >= 2 steps."""
    # 8 MiB per input buffer -> 16 MiB double-buffered, comfortably inside the
    # 32 MiB default scoped VMEM (and v7x's smaller 64 MiB physical VMEM).
    budget = 8 * 1024 * 1024
    max_nb = max(1, budget // max(1, c * hw * itemsize))
    divisors = [d for d in range(1, n + 1) if n % d == 0]
    # Prefer leaving >= 2 grid steps so the "parallel" axis feeds both v7x TCs.
    cands = [d for d in divisors if d <= max_nb and n // d >= 2]
    if not cands:
        cands = [d for d in divisors if d <= max_nb] or [1]
    return max(cands)


def channel_attention(x_nchw, w1, b1, w2, b2):
    """Pallas implementation of ChannelAttentionModule.forward.

    x_nchw: (N, C, H, W) float32 / bfloat16
    w1:     (mid, C)  b1: (mid,)   -- first nn.Linear (PyTorch layout)
    w2:     (C, mid)  b2: (C,)     -- second nn.Linear
    returns: (N, C, 1, 1) float32 sigmoid attention weights
    """
    N, C, H, W = x_nchw.shape
    HW = H * W
    mid = w1.shape[0]

    nb = _pick_nb(N, C, HW, x_nchw.dtype.itemsize)
    g = N // nb

    # Host-side layout plumbing (pure reshapes / tiny transposes, free):
    x_blk = x_nchw.reshape(g, nb, C, HW)                       # HW on lane axis
    w1t = jnp.asarray(w1, jnp.float32).T                       # (C, mid)
    w2t = jnp.asarray(w2, jnp.float32).T                       # (mid, C)
    b1_row = jnp.asarray(b1, jnp.float32).reshape(1, mid)
    b2x2_row = 2.0 * jnp.asarray(b2, jnp.float32).reshape(1, C)  # branch-fused bias

    # TODO(synk): for very large H*W (per-image block approaching v7x's 64 MiB
    # VMEM), add an "arbitrary" HW grid axis with running sum/max accumulators
    # in VMEM scratch instead of one whole-image block.
    out = pl.pallas_call(
        _cam_kernel,
        out_shape=jax.ShapeDtypeStruct((g, nb, C), jnp.float32),
        grid_spec=pltpu.PrefetchScalarGridSpec(
            num_scalar_prefetch=0,
            grid=(g,),
            in_specs=[
                pl.BlockSpec((1, nb, C, HW), lambda n: (n, 0, 0, 0)),
                # Constant index maps -> weights/biases stay VMEM-resident for
                # the whole grid (no re-DMA between consecutive steps).
                pl.BlockSpec((C, mid), lambda n: (0, 0)),
                pl.BlockSpec((1, mid), lambda n: (0, 0)),
                pl.BlockSpec((mid, C), lambda n: (0, 0)),
                pl.BlockSpec((1, C), lambda n: (0, 0)),
            ],
            out_specs=pl.BlockSpec((1, nb, C), lambda n: (n, 0, 0)),
        ),
        compiler_params=pltpu.CompilerParams(
            # Batch axis is embarrassingly parallel -> shard over v7x's 2 TCs.
            dimension_semantics=("parallel",),
        ),
    )(x_blk, w1t, b1_row, w2t, b2x2_row)

    return out.reshape(N, C, 1, 1)


def _reference(x, w1, b1, w2, b2):
    # Pure-JAX reference matching the PyTorch module exactly.
    N, C, H, W = x.shape
    avg = jnp.mean(x, axis=(2, 3))   # (N, C)
    mx = jnp.max(x, axis=(2, 3))     # (N, C)

    def mlp(v):
        h = jnp.maximum(v @ w1.T + b1, 0.0)
        return h @ w2.T + b2

    y = jax.nn.sigmoid(mlp(avg) + mlp(mx))
    return y.reshape(N, C, 1, 1)


if __name__ == "__main__":
    # ChannelAttentionModule(c1=32, reduction=16) -> mid_channel = 2.
    # (c1 must be >= reduction for the module to be well-defined.)
    N, C, H, W = 16, 32, 16, 16
    reduction = 16
    mid = C // reduction

    key = jax.random.PRNGKey(0)
    kx, k1, kb1, k2, kb2 = jax.random.split(key, 5)

    x = jax.random.normal(kx, (N, C, H, W), dtype=jnp.float32)

    # Deterministic Linear params (PyTorch (out_features, in_features) layout),
    # scaled roughly like torch's default init.
    w1 = jax.random.normal(k1, (mid, C), dtype=jnp.float32) / math.sqrt(C)
    b1 = jax.random.normal(kb1, (mid,), dtype=jnp.float32) / math.sqrt(C)
    w2 = jax.random.normal(k2, (C, mid), dtype=jnp.float32) / math.sqrt(mid)
    b2 = jax.random.normal(kb2, (C,), dtype=jnp.float32) / math.sqrt(mid)

    out = channel_attention(x, w1, b1, w2, b2)
    out = jax.block_until_ready(out)

    ref = _reference(x, w1, b1, w2, b2)
    np.testing.assert_allclose(np.asarray(out), np.asarray(ref), rtol=1e-5, atol=1e-5)

    assert out.shape == (N, C, 1, 1)
    print("KERNEL_OK")
</pallas_src>

<mosaic_0001>
module attributes {stable_mosaic.version = 11 : i64} {
  func.func @_cam_kernel(%arg0: i32, %arg1: memref<1x8x32x256xf32, #tpu.memory_space<vmem>>, %arg2: memref<32x2xf32, #tpu.memory_space<vmem>>, %arg3: memref<1x2xf32, #tpu.memory_space<vmem>>, %arg4: memref<2x32xf32, #tpu.memory_space<vmem>>, %arg5: memref<1x32xf32, #tpu.memory_space<vmem>>, %arg6: memref<1x8x32xf32, #tpu.memory_space<vmem>>) attributes {dimension_semantics = [#tpu.dimension_semantics<parallel>], iteration_bounds = array<i64: 2>, scalar_prefetch = 0 : i64, scratch_operands = 0 : i64, tpu.core_type = #tpu.core_type<tc>, window_params = [{transform_indices = @transform_0, window_bounds = array<i64: 1, 8, 32, 256>}, {pipeline_mode = #tpu.pipeline_mode<synchronous>, transform_indices = @transform_1, window_bounds = array<i64: 32, 2>}, {pipeline_mode = #tpu.pipeline_mode<synchronous>, transform_indices = @transform_2, window_bounds = array<i64: 1, 2>}, {pipeline_mode = #tpu.pipeline_mode<synchronous>, transform_indices = @transform_3, window_bounds = array<i64: 2, 32>}, {pipeline_mode = #tpu.pipeline_mode<synchronous>, transform_indices = @transform_4, window_bounds = array<i64: 1, 32>}, {transform_indices = @transform_5, window_bounds = array<i64: 1, 8, 32>}]} {
    %c0 = arith.constant 0 : index
    %c0_0 = arith.constant 0 : index
    %c0_1 = arith.constant 0 : index
    %c0_2 = arith.constant 0 : index
    %0 = vector.load %arg1[%c0, %c0_0, %c0_1, %c0_2] : memref<1x8x32x256xf32, #tpu.memory_space<vmem>>, vector<1x8x32x256xf32>
    %1 = vector.shape_cast %0 : vector<1x8x32x256xf32> to vector<8x32x256xf32>
    %cst = arith.constant dense<0.000000e+00> : vector<8x32xf32>
    %2 = vector.multi_reduction <add>, %1, %cst [2] : vector<8x32x256xf32> to vector<8x32xf32>
    %cst_3 = arith.constant 3.906250e-03 : f32
    %3 = vector.broadcast %cst_3 : f32 to vector<8x32xf32>
    %4 = arith.mulf %2, %3 : vector<8x32xf32>
    %cst_4 = arith.constant dense<0xFF800000> : vector<8x32xf32>
    %5 = vector.multi_reduction <maximumf>, %1, %cst_4 [2] : vector<8x32x256xf32> to vector<8x32xf32>
    %6 = tpu.concatenate %4, %5 in 0 : vector<8x32xf32>, vector<8x32xf32> -> vector<16x32xf32>
    %c0_5 = arith.constant 0 : index
    %c0_6 = arith.constant 0 : index
    %7 = vector.load %arg2[%c0_5, %c0_6] : memref<32x2xf32, #tpu.memory_space<vmem>>, vector<32x2xf32>
    %cst_7 = arith.constant dense<0.000000e+00> : vector<16x2xf32>
    %8 = tpu.matmul %6, %7, %cst_7 {dimension_numbers = #tpu.dot_dimension_numbers<[1], [0], [0], [1], [0, 0, 1, 1], [], []>} : vector<16x32xf32>, vector<32x2xf32>, vector<16x2xf32> -> vector<16x2xf32>
    %c0_8 = arith.constant 0 : index
    %c0_9 = arith.constant 0 : index
    %9 = vector.load %arg3[%c0_8, %c0_9] : memref<1x2xf32, #tpu.memory_space<vmem>>, vector<1x2xf32>
    %10 = vector.broadcast %9 : vector<1x2xf32> to vector<16x2xf32>
    %11 = arith.addf %8, %10 : vector<16x2xf32>
    %cst_10 = arith.constant 0.000000e+00 : f32
    %12 = vector.broadcast %cst_10 : f32 to vector<16x2xf32>
    %13 = arith.maximumf %11, %12 : vector<16x2xf32>
    %14 = vector.extract_strided_slice %13 {offsets = [0, 0], sizes = [8, 2], strides = [1, 1]} : vector<16x2xf32> to vector<8x2xf32>
    %15 = vector.extract_strided_slice %13 {offsets = [8, 0], sizes = [8, 2], strides = [1, 1]} : vector<16x2xf32> to vector<8x2xf32>
    %16 = arith.addf %14, %15 : vector<8x2xf32>
    %c0_11 = arith.constant 0 : index
    %c0_12 = arith.constant 0 : index
    %17 = vector.load %arg4[%c0_11, %c0_12] : memref<2x32xf32, #tpu.memory_space<vmem>>, vector<2x32xf32>
    %cst_13 = arith.constant dense<0.000000e+00> : vector<8x32xf32>
    %18 = tpu.matmul %16, %17, %cst_13 {dimension_numbers = #tpu.dot_dimension_numbers<[1], [0], [0], [1], [0, 0, 1, 1], [], []>} : vector<8x2xf32>, vector<2x32xf32>, vector<8x32xf32> -> vector<8x32xf32>
    %c0_14 = arith.constant 0 : index
    %c0_15 = arith.constant 0 : index
    %19 = vector.load %arg5[%c0_14, %c0_15] : memref<1x32xf32, #tpu.memory_space<vmem>>, vector<1x32xf32>
    %20 = vector.broadcast %19 : vector<1x32xf32> to vector<8x32xf32>
    %21 = arith.addf %18, %20 : vector<8x32xf32>
    %22 = arith.negf %21 : vector<8x32xf32>
    %23 = math.exp %22 : vector<8x32xf32>
    %cst_16 = arith.constant 1.000000e+00 : f32
    %24 = vector.broadcast %cst_16 : f32 to vector<8x32xf32>
    %25 = arith.addf %24, %23 : vector<8x32xf32>
    %26 = arith.divf %24, %25 : vector<8x32xf32>
    %c0_17 = arith.constant 0 : index
    %c0_18 = arith.constant 0 : index
    %c0_19 = arith.constant 0 : index
    %27 = vector.load %arg6[%c0_17, %c0_18, %c0_19] : memref<1x8x32xf32, #tpu.memory_space<vmem>>, vector<1x8x32xf32>
    %28 = vector.shape_cast %27 : vector<1x8x32xf32> to vector<8x32xf32>
    %29 = vector.shape_cast %26 : vector<8x32xf32> to vector<1x8x32xf32>
    tpu.vector_store %arg6[%c0_17, %c0_18, %c0_19], %29 {strides = array<i32>} : memref<1x8x32xf32, #tpu.memory_space<vmem>>, vector<1x8x32xf32>,
    return
  }
  func.func @transform_0(%arg0: i32) -> (i32, i32, i32, i32) {
    %c0_i32 = arith.constant 0 : i32
    %c0_i32_0 = arith.constant 0 : i32
    %c0_i32_1 = arith.constant 0 : i32
    %c0_i32_2 = arith.constant 0 : i32
    return %arg0, %c0_i32, %c0_i32_0, %c0_i32_1 : i32, i32, i32, i32
  }
  func.func @transform_1(%arg0: i32) -> (i32, i32) {
    %c0_i32 = arith.constant 0 : i32
    %c0_i32_0 = arith.constant 0 : i32
    %c0_i32_1 = arith.constant 0 : i32
    return %c0_i32, %c0_i32_0 : i32, i32
  }
  func.func @transform_2(%arg0: i32) -> (i32, i32) {
    %c0_i32 = arith.constant 0 : i32
    %c0_i32_0 = arith.constant 0 : i32
    %c0_i32_1 = arith.constant 0 : i32
    return %c0_i32, %c0_i32_0 : i32, i32
  }
  func.func @transform_3(%arg0: i32) -> (i32, i32) {
    %c0_i32 = arith.constant 0 : i32
    %c0_i32_0 = arith.constant 0 : i32
    %c0_i32_1 = arith.constant 0 : i32
    return %c0_i32, %c0_i32_0 : i32, i32
  }
  func.func @transform_4(%arg0: i32) -> (i32, i32) {
    %c0_i32 = arith.constant 0 : i32
    %c0_i32_0 = arith.constant 0 : i32
    %c0_i32_1 = arith.constant 0 : i32
    return %c0_i32, %c0_i32_0 : i32, i32
  }
  func.func @transform_5(%arg0: i32) -> (i32, i32, i32) {
    %c0_i32 = arith.constant 0 : i32
    %c0_i32_0 = arith.constant 0 : i32
    %c0_i32_1 = arith.constant 0 : i32
    return %arg0, %c0_i32, %c0_i32_0 : i32, i32, i32
  }
}

</mosaic_0001>

<bundles_post_ra>
// kernel: tpu_custom_call.1
= control target key start
LH: loop header
LB: loop body
LE: loop exit
PB: predicated region body
PF: predicated region fallthrough
CT: control target
= control target key end

     0   :  { %10 = vsyncpa [#allocation3], 0  ;;  %s1675_s0 = inlined_call_operand.hbm [shape: f32[2,8,32,256], index: 0, kind: input, shape index: {}]   ;;  %s1676_s1 = inlined_call_operand.vmem [shape: f32[32,2], index: 1, kind: input, shape index: {}]   ;;  %s1677_s2 = inlined_call_operand.vmem [shape: f32[1,2], index: 2, kind: input, shape index: {}]   ;;  %s1678_s3 = inlined_call_operand.vmem [shape: f32[2,32], index: 3, kind: input, shape index: {}]   ;;  %s1679_s4 = inlined_call_operand.vmem [shape: f32[1,32], index: 4, kind: input, shape index: {}]   ;;  %s1680_s5 = inlined_call_operand.hbm [shape: f32[2,8,32], index: 5, kind: output, shape index: {}]  }
   0x1   :  { %12 = vsyncpa [#allocation3 + $0x1], 0 }
   0x2   :  { %13 = vsyncpa [#allocation4], 0 }
   0x3   :  { %15 = vsyncpa [#allocation4 + $0x1], 0  ;;  %s1123_s18 = smov 0   ;;  %s1125_s19 = smov 0  }
   0x4   :  { %s1127_s20 = smov 0   ;;  %s1129_s21 = smov 0  }
   0x5 LB: > { %s1144_s22 = sadd.s32 4294967295, %s1089_s21   ;;  %s916_s23 = sadd.s32 4294967294, %s1089_s21   ;;  %s1089_s21 = sphi %s1129_s21, %s1690_s21   ;;  %s1085_s20 = sphi %s1127_s20, %s1689_s20   ;;  %s1081_s19 = sphi %s1125_s19, %s1688_s19   ;;  %s1077_s18 = sphi %s1123_s18, %s1687_s18  }
   0x6   : > { %s1148_s24 = sadd.s32 1, %s1089_s21   ;;  %s28_s25 = sadd.s32 1, %s1085_s20 }
   0x7   : > { %s25_s26 = ssub.s32 %s1089_s21, %s1148_s24  ;;  %p35_p0 = scmp.ne.s32.totalorder %s1085_s20, %s1081_s19 }
   0x8   : > { %p26_p1 = scmp.eq.s32.totalorder %s25_s26, 0  ;;  %p36_p2 = scmp.eq.s32.totalorder %s1089_s21, 0 }
   0x9   : > { %p41_p3 = scmp.ne.s32.totalorder %s1081_s19, %s1077_s18  ;;  %p42_p4 = scmp.eq.s32.totalorder %s1144_s22, 0 }
   0xa   : > { %s1160_s27 = scalar_select %p26_p1, %s1085_s20, %s28_s25  }
   0xb   : > { %p1162_p5 = por %p36_p2, %p35_p0  ;;  %p1166_p6 = por %p42_p4, %p41_p3 }
   0xc   : > { %p149_p7 = scmp.eq.s32.totalorder %s1144_s22, 1  ;;  %p155_p8 = scmp.eq.s32.totalorder %s916_s23, 1 }
   0xd   : > { %p951_p10 = scmp.lt.s32.totalorder %s1089_s21, 2  ;;  %s187_s7 = sand.u32 1, %s1085_s20  }
   0xe   : > { %p1173_p11 = por %p149_p7, %p35_p0  ;;  %p1177_p12 = por %p155_p8, %p41_p3 }
   0xf   : > { %s934_s8 = sshll.u32 %s1089_s21, 9  ;;  %s919_s9 = sshll.u32 %s187_s7, 9 }
  0x10   : > { %s196_s12 = scalar_lea.hbm %s1675_s0, %s934_s8  ;;  %s191_s14 = scalar_lea.vmem [#allocation2], %s919_s9 }
  0x11   : > { %s197_s13 = sshll.u32 %s196_s12, 4  ;;  %s199_s15 = sshll.u32 %s191_s14, 4  ;;  %s198_s13 = int_to_ptr.hbm [resolvable:$true] %s197_s13  ;;  %s200_s15 = int_to_ptr.vmem [resolvable:$true] %s199_s15 }
  0x12   : > { %p1188_p13 = pnand %p951_p10, %p1162_p5  ;;  %p922_p0 = scmp.ge.s32.totalorder %s1089_s21, 1 }
  0x13   : > { %p207_p1 = scmp.lt.s32.totalorder %s1089_s21, 3  ;;  %s188_s17 = scalar_lea.sflag [#allocation3], %s187_s7 }
  0x14   : > { %s993_s23 = sshra.s32 %s198_s13, 4  ;;  %p997_p3 = pneg %p1188_p13  ;;  %s994_s23 = int_to_ptr.hbm [resolvable:$true] %s993_s23 }
  0x15   : > { %s995_s25 = scalar_lea.hbm %s994_s23, 512  ;;  %s1000_s28 = scalar_lea.hbm %s1675_s0, 1024 }
  0x16   : > { %p996_p2 = scmp.ne.s32.totalorder %s994_s23, %s995_s25  ;;  %p1001_p5 = scmp.lt.s32.totalorder %s994_s23, %s1675_s0 }
  0x17   : > { %p1002_p8 = scmp.lt.s32.totalorder %s1000_s28, %s995_s25 }
  0x18   : > { %p998_p4 = pnand %p997_p3, %p996_p2 }
  0x19   : > { %p1003_p10 = por %p1002_p8, %p1001_p5 }
  0x1a   : > { %p999_p7 = pneg %p998_p4 }
  0x1c   : > { %p1004_p9 = pnand %p1003_p10, %p999_p7 }
  0x1e   : > { %1007 = shalt.err (!%p1004_p9)
}
  0x1f   : > { %s1091_s7 = smov 256   ;;  %s1092_s11 = smov 16  }
  0x20   : > { %946 = dma.hbm_to_vmem [thread:$0]  (!%p1188_p13), %s198_s13, 8192, %s200_s15, %s188_s17, %s1091_s7, %s1091_s7, %s1092_s11  }
  0x21   : > { %p208_p2 = pnand %p922_p0, %p207_p1 }
  0x22   : > { %s1209_s12 = sand.u32 (!%p208_p2), 1, %s1081_s19  }
  0x23   : > { %211 = sbr.rel (%p208_p2) target bundleno = 627 (0x273), region = 40  ;;  %s923_s14 = sshll.u32 (!%p208_p2), %s1209_s12, 9 }
  0x24   : > { %s214_s23 = scalar_lea.sflag (!%p208_p2), [#allocation3], %s1209_s12  ;;  %s1213_s25 = scalar_lea.vmem (!%p208_p2), [#allocation2], %s923_s14 }
  0x28   : > { %1068 = dma.done.wait (%p1166_p6), %s214_s23, 8192  }
  0x29   : > { %1070 = vsyncadd (%p1166_p6), %s214_s23, 4294959104  ;;  %v1220_v0 = vld [vmem:[%s1213_s25 + $0x40] sm:$0xff]  ;;  %v1223_v1 = vld [vmem:[%s1213_s25 + $0x48] sm:$0xff]  ;;  %vm570_vm0 = vcmask 130112   ;;  %vm574_vm1 = vcmask 195712   ;;  %vm578_vm2 = vcmask 261312  }
  0x2a   : > { %v1226_v2 = vld [vmem:[%s1213_s25 + $0x20] sm:$0xff]  ;;  %v449_v3 = vmax.f32 %v1220_v0, %v1223_v1  ;;  %v1231_v4 = vld [vmem:[%s1213_s25 + $0x28] sm:$0xff]  ;;  %v255_v9 = vld [vmem:[%s1213_s25 + $0x50] sm:$0xff]  ;;  %v321_v52 = vadd.f32 %v1223_v1, %v1220_v0  ;;  %vm629_vm3 = vcmask 1041409   ;;  %vm631_vm4 = vcmask 1042434   ;;  %s931_s29 = sshll.u32 %s1144_s22, 3 }
  0x2b   : > { %v245_v5 = vld [vmem:[%s1213_s25] sm:$0xff]  ;;  %v246_v6 = vld [vmem:[%s1213_s25 + $0x8] sm:$0xff]  ;;  %v443_v7 = vmax.f32 %v1226_v2, %v1231_v4  ;;  %v256_v10 = vld [vmem:[%s1213_s25 + $0x58] sm:$0xff]  ;;  %vm633_vm5 = vcmask 1043459   ;;  %vm635_vm6 = vcmask 1044484   ;;  %vm637_vm7 = vcmask 1045509   ;;  %s841_s16 = scalar_lea.hbm %s1680_s5, %s931_s29 }
  0x2c   : > { %v437_v8 = vmax.f32 %v245_v5, %v246_v6  ;;  %450 = vmax.xlane.f32.xlu1 %v449_v3  ;;  %v1240_v11 = vld [vmem:[%s1213_s25 + $0x60] sm:$0xff]  ;;  %v1243_v12 = vld [vmem:[%s1213_s25 + $0x68] sm:$0xff]  ;;  %v247_v13 = vld [vmem:[%s1213_s25 + $0x10] sm:$0xff]  ;;  %v452_v15 = vmax.f32 %v255_v9, %v256_v10  ;;  %v309_v51 = vadd.f32 %v246_v6, %v245_v5  ;;  %v324_v54 = vadd.f32 %v256_v10, %v255_v9  ;;  %s845_s8 = sshll.u32 %s841_s16, 4  ;;  %s831_s22 = scalar_lea.sflag [#allocation4], %s1209_s12  ;;  %s846_s8 = int_to_ptr.hbm [resolvable:$true] %s845_s8 }
  0x2d   : > { %444 = vmax.xlane.f32.xlu2 %v443_v7  ;;  %v248_v14 = vld [vmem:[%s1213_s25 + $0x18] sm:$0xff]  ;;  %v455_v16 = vmax.f32 %v1240_v11, %v1243_v12  ;;  %v1250_v18 = vld [vmem:[%s1213_s25 + $0x90] sm:$0xff]  ;;  %v1258_v22 = vld [vmem:[%s1213_s25 + $0x80] sm:$0xff]  ;;  %v315_v6 = vadd.f32 %v1231_v4, %v1226_v2  ;;  %vm639_vm8 = vcmask 1046534   ;;  %vm641_vm9 = vcmask 1047559   ;;  %s1037_s28 = sshra.s32 %s846_s8, 4  ;;  %s1038_s28 = int_to_ptr.hbm [resolvable:$true] %s1037_s28 }
  0x2e   : > { %438 = vmax.xlane.f32.xlu0 %v437_v8  ;;  %v440_v17 = vmax.f32 %v247_v13, %v248_v14  ;;  %v1253_v19 = vld [vmem:[%s1213_s25 + $0x98] sm:$0xff]  ;;  %v251_v20 = vld [vmem:[%s1213_s25 + $0x30] sm:$0xff]  ;;  %v1261_v23 = vld [vmem:[%s1213_s25 + $0x88] sm:$0xff]  ;;  %v312_v53 = vadd.f32 %v248_v14, %v247_v13  ;;  %v327_v8 = vadd.f32 %v1243_v12, %v1240_v11  ;;  %vm746_vm10 = vcmask 261120   ;;  %s1039_s9 = scalar_lea.hbm %s1038_s28, 8  ;;  %s1043_s11 = scalar_lea.hbm %s1680_s5, 16 }
  0x2f   : > { %v252_v21 = vld [vmem:[%s1213_s25 + $0x38] sm:$0xff]  ;;  %v464_v24 = vmax.f32 %v1250_v18, %v1253_v19  ;;  %v461_v26 = vmax.f32 %v1258_v22, %v1261_v23  ;;  %v265_v27 = vld [vmem:[%s1213_s25 + $0xa0] sm:$0xff]  ;;  %v266_v28 = vld [vmem:[%s1213_s25 + $0xa8] sm:$0xff]  ;;  %v336_v2 = vadd.f32 %v1253_v19, %v1250_v18  ;;  %v333_v4 = vadd.f32 %v1261_v23, %v1258_v22  ;;  %p1040_p6 = scmp.ne.s32.totalorder %s1038_s28, %s1039_s9  ;;  %p1044_p0 = scmp.lt.s32.totalorder %s1038_s28, %s1680_s5 }
  0x30   : > { %v446_v25 = vmax.f32 %v251_v20, %v252_v21  ;;  %v269_v29 = vld [vmem:[%s1213_s25 + $0xc0] sm:$0xff]  ;;  %v270_v30 = vld [vmem:[%s1213_s25 + $0xc8] sm:$0xff]  ;;  %v1272_v31 = vld [vmem:[%s1213_s25 + $0x70] sm:$0xff]  ;;  %v467_v33 = vmax.f32 %v265_v27, %v266_v28  ;;  %v318_v0 = vadd.f32 %v252_v21, %v251_v20  ;;  %v339_v1 = vadd.f32 %v266_v28, %v265_v27  ;;  %p1045_p1 = scmp.lt.s32.totalorder %s1043_s11, %s1039_s9 }
  0x31   : > { %v1275_v32 = vld [vmem:[%s1213_s25 + $0x78] sm:$0xff]  ;;  %v473_v34 = vmax.f32 %v269_v29, %v270_v30  ;;  %v1280_v36 = vld [vmem:[%s1213_s25 + $0xb0] sm:$0xff]  ;;  %v1286_v38 = vld [vmem:[%s1213_s25 + $0xe0] sm:$0xff]  ;;  %v345_v9 = vadd.f32 %v270_v30, %v269_v29  ;;  %vm786_vm11 = vcmask 1041408   ;;  %vm782_vm12 = vcmask 15360   ;;  %p1041_p9 = pnand %p1040_p6, %p1173_p11 }
  0x32   : > { %v458_v35 = vmax.f32 %v1272_v31, %v1275_v32  ;;  %v1283_v37 = vld [vmem:[%s1213_s25 + $0xb8] sm:$0xff]  ;;  %v1289_v39 = vld [vmem:[%s1213_s25 + $0xe8] sm:$0xff]  ;;  %v1292_v40 = vld [vmem:[%s1213_s25 + $0xd0] sm:$0xff]  ;;  %v330_v18 = vadd.f32 %v1275_v32, %v1272_v31  ;;  %p1046_p3 = por %p1045_p1, %p1044_p0 }
  0x33   : > { %v1295_v41 = vld [vmem:[%s1213_s25 + $0xd8] sm:$0xff]  ;;  %v470_v42 = vmax.f32 %v1280_v36, %v1283_v37  ;;  %v479_v43 = vmax.f32 %v1286_v38, %v1289_v39  ;;  %v1304_v45 = vld [vmem:[%s1213_s25 + $0x110] sm:$0xff]  ;;  %v1310_v47 = vld [vmem:[%s1213_s25 + $0x100] sm:$0xff]  ;;  %p1042_p13 = pneg %p1041_p9 }
  0x34   : > { %453 = vmax.xlane.f32.xlu1 %v452_v15  ;;  %v476_v44 = vmax.f32 %v1292_v40, %v1295_v41  ;;  %v1307_v46 = vld [vmem:[%s1213_s25 + $0x118] sm:$0xff]  ;;  %v1313_v48 = vld [vmem:[%s1213_s25 + $0x108] sm:$0xff]  ;;  %v1322_v55 = vld [vmem:[%s1213_s25 + $0x120] sm:$0xff]  ;;  %v348_v23 = vadd.f32 %v1295_v41, %v1292_v40  ;;  %v351_v41 = vadd.f32 %v1289_v39, %v1286_v38  ;;  %v565_v38 = vlaneseq }
  0x35   : > { %456 = vmax.xlane.f32.xlu2 %v455_v16  ;;  %v488_v49 = vmax.f32 %v1304_v45, %v1307_v46  ;;  %v485_v50 = vmax.f32 %v1310_v47, %v1313_v48  ;;  %v1325_v56 = vld [vmem:[%s1213_s25 + $0x128] sm:$0xff]  ;;  %v1328_v57 = vld [vmem:[%s1213_s25 + $0xf0] sm:$0xff]  ;;  %v1331_v58 = vld [vmem:[%s1213_s25 + $0xf8] sm:$0xff]  ;;  %p1047_p4 = pnand %p1046_p3, %p1042_p13 }
  0x36   : > { %441 = vmax.xlane.f32.xlu0 %v440_v17  ;;  %v1334_v59 = vld [vmem:[%s1213_s25 + $0x140] sm:$0xff]  ;;  %v1337_v60 = vld [vmem:[%s1213_s25 + $0x148] sm:$0xff]  ;;  %v491_v61 = vmax.f32 %v1322_v55, %v1325_v56  ;;  %v482_v62 = vmax.f32 %v1328_v57, %v1331_v58  ;;  %v1346_v3 = vld [vmem:[%s1213_s25 + $0x150] sm:$0xff] }
  0x37   : > { %v497_v63 = vmax.f32 %v1334_v59, %v1337_v60  ;;  %v1349_v5 = vld [vmem:[%s1213_s25 + $0x158] sm:$0xff]  ;;  %v283_v10 = vld [vmem:[%s1213_s25 + $0x130] sm:$0xff]  ;;  %v293_v11 = vld [vmem:[%s1213_s25 + $0x180] sm:$0xff] }
  0x38   : > { %v500_v7 = vmax.f32 %v1346_v3, %v1349_v5  ;;  %v284_v13 = vld [vmem:[%s1213_s25 + $0x138] sm:$0xff]  ;;  %v294_v12 = vld [vmem:[%s1213_s25 + $0x188] sm:$0xff]  ;;  %v289_v15 = vld [vmem:[%s1213_s25 + $0x160] sm:$0xff] }
  0x39   : > { %v494_v14 = vmax.f32 %v283_v10, %v284_v13  ;;  %v290_v16 = vld [vmem:[%s1213_s25 + $0x168] sm:$0xff]  ;;  %v295_v17 = vld [vmem:[%s1213_s25 + $0x190] sm:$0xff]  ;;  %v296_v20 = vld [vmem:[%s1213_s25 + $0x198] sm:$0xff]  ;;  %v509_v21 = vmax.f32 %v293_v11, %v294_v12  ;;  %v1405_v40 = vadd.f32 %v284_v13, %v283_v10 }
  0x3a   : > { %v1372_v19 = vld [vmem:[%s1213_s25 + $0x170] sm:$0xff]  ;;  %v1375_v22 = vld [vmem:[%s1213_s25 + $0x178] sm:$0xff]  ;;  %v1382_v27 = vld [vmem:[%s1213_s25 + $0x1c0] sm:$0xff] }
  0x3b   : > { %v1385_v28 = vld [vmem:[%s1213_s25 + $0x1c8] sm:$0xff]  ;;  %v1388_v29 = vld [vmem:[%s1213_s25 + $0x1a0] sm:$0xff]  ;;  %v1394_v31 = vld [vmem:[%s1213_s25 + $0x1d0] sm:$0xff] }
  0x3c   : > { %465 = vmax.xlane.f32.xlu1 %v464_v24  ;;  %v503_v24 = vmax.f32 %v289_v15, %v290_v16  ;;  %v1391_v30 = vld [vmem:[%s1213_s25 + $0x1a8] sm:$0xff]  ;;  %v1397_v32 = vld [vmem:[%s1213_s25 + $0x1d8] sm:$0xff]  ;;  %v1426_v39 = vld [vmem:[%s1213_s25 + $0x1e0] sm:$0xff] }
  0x3d   : > { %447 = vmax.xlane.f32.xlu2 %v446_v25  ;;  %v512_v25 = vmax.f32 %v295_v17, %v296_v20 }
  0x3e   : > { %462 = vmax.xlane.f32.xlu0 %v461_v26  ;;  %v506_v26 = vmax.f32 %v1372_v19, %v1375_v22 }
  0x44   : > { %468 = vmax.xlane.f32.xlu1 %v467_v33  ;;  %v521_v33 = vmax.f32 %v1382_v27, %v1385_v28 }
  0x45   : > { %474 = vmax.xlane.f32.xlu2 %v473_v34  ;;  %v515_v34 = vmax.f32 %v1388_v29, %v1391_v30 }
  0x46   : > { %459 = vmax.xlane.f32.xlu0 %v458_v35  ;;  %v524_v35 = vmax.f32 %v1394_v31, %v1397_v32 }
  0x4c   : > { %471 = vmax.xlane.f32.xlu1 %v470_v42  ;;  %v342_v42 = vadd.f32 %v1283_v37, %v1280_v36  ;;  %v1429_v36 = vld [vmem:[%s1213_s25 + $0x1e8] sm:$0xff] }
  0x4d   : > { %480 = vmax.xlane.f32.xlu2 %v479_v43  ;;  %v357_v43 = vadd.f32 %v1313_v48, %v1310_v47 }
  0x4e   : > { %477 = vmax.xlane.f32.xlu0 %v476_v44  ;;  %v1413_v44 = vadd.f32 %v294_v12, %v293_v11 }
  0x54   : > { %489 = vmax.xlane.f32.xlu1 %v488_v49  ;;  %v1415_v49 = vadd.f32 %v290_v16, %v289_v15  ;;  %v1468_v15 = vld [vmem:[%s1213_s25 + $0x1f8] sm:$0xff] }
  0x55   : > { %310 = vadd.xlane.f32.xlu2 %v309_v51  ;;  %v1420_v51 = vld [vmem:[%s1213_s25 + $0x1b0] sm:$0xff] }
  0x56   : > { %486 = vmax.xlane.f32.xlu0 %v485_v50  ;;  %v1417_v50 = vadd.f32 %v296_v20, %v295_v17 }
  0x5c   : > { %322 = vadd.xlane.f32.xlu1 %v321_v52  ;;  %v1423_v52 = vld [vmem:[%s1213_s25 + $0x1b8] sm:$0xff] }
  0x5d   : > { %325 = vadd.xlane.f32.xlu2 %v324_v54  ;;  %v360_v54 = vadd.f32 %v1307_v46, %v1304_v45 }
  0x5e   : > { %313 = vadd.xlane.f32.xlu0 %v312_v53  ;;  %v518_v53 = vmax.f32 %v1420_v51, %v1423_v52 }
  0x64   : > { %492 = vmax.xlane.f32.xlu1 %v491_v61  ;;  %v527_v61 = vmax.f32 %v1426_v39, %v1429_v36 }
  0x65   : > { %498 = vmax.xlane.f32.xlu2 %v497_v63 }
  0x66   : > { %483 = vmax.xlane.f32.xlu0 %v482_v62  ;;  %v1437_v62 = vand.u32 127, %v565_v38 }
  0x68   : > { %v1440_v63 = vadd.s32 4294967288, %v1437_v62 }
  0x6c   : > { %316 = vadd.xlane.f32.xlu1 %v315_v6 }
  0x6d   : > { %328 = vadd.xlane.f32.xlu2 %v327_v8  ;;  %v363_v8 = vadd.f32 %v1325_v56, %v1322_v55 }
  0x6e   : > { %501 = vmax.xlane.f32.xlu0 %v500_v7 }
  0x74   : > { %337 = vadd.xlane.f32.xlu1 %v336_v2 }
  0x75   : > { %495 = vmax.xlane.f32.xlu2 %v494_v14 }
  0x76   : > { %334 = vadd.xlane.f32.xlu0 %v333_v4  ;;  %v369_v4 = vadd.f32 %v1337_v60, %v1334_v59 }
  0x7c   : > { %510 = vmax.xlane.f32.xlu1 %v509_v21 }
  0x7d   : > { %513 = vmax.xlane.f32.xlu2 %v512_v25  ;;  %v372_v25 = vadd.f32 %v1349_v5, %v1346_v3 }
  0x7e   : > { %504 = vmax.xlane.f32.xlu0 %v503_v24 }
  0x84   : > { %331 = vadd.xlane.f32.xlu1 %v330_v18 }
  0x85   : > { %340 = vadd.xlane.f32.xlu2 %v339_v1  ;;  %v1444_v1 = vadd.s32 4294967280, %v1437_v62 }
  0x86   : > { %319 = vadd.xlane.f32.xlu0 %v318_v0 }
  0x8c   : > { %349 = vadd.xlane.f32.xlu1 %v348_v23 }
  0x8d   : > { %507 = vmax.xlane.f32.xlu2 %v506_v26 }
  0x8e   : > { %346 = vadd.xlane.f32.xlu0 %v345_v9  ;;  %v354_v9 = vadd.f32 %v1331_v58, %v1328_v57  ;;  %v1462_v57 = vadd.s32 4294967272, %v1437_v62  ;;  %v1465_v58 = vld [vmem:[%s1213_s25 + $0x1f0] sm:$0xff]  ;;  %s924_s25 = sshll.u32 %s1209_s12, 3 }
  0x8f   : > { %v530_v20 = vmax.f32 %v1465_v58, %v1468_v15  ;;  %s244_s17 = scalar_lea.vmem [#allocation5], %s924_s25 }
  0x90   : > { %s843_s26 = sshll.u32 %s244_s17, 4  ;;  %s844_s26 = int_to_ptr.vmem [resolvable:$true] %s843_s26 }
  0x94   : > { %522 = vmax.xlane.f32.xlu1 %v521_v33 }
  0x95   : > { %525 = vmax.xlane.f32.xlu2 %v524_v35 }
  0x96   : > { %516 = vmax.xlane.f32.xlu0 %v515_v34 }
  0x9c   : > { %352 = vadd.xlane.f32.xlu1 %v351_v41 }
  0x9d   : > { %358 = vadd.xlane.f32.xlu2 %v357_v43 }
  0x9e   : > { %343 = vadd.xlane.f32.xlu0 %v342_v42 }
  0x9f   : > { %v451_v37 = vpop.xlane.xlu1 %450 }
  0xa0   : > { %v445_v47 = vpop.xlane.xlu2 %444  ;;  %v682_v0 = vperm.slane %v451_v37, %v1437_v62 }
  0xa1   : > { %v439_v48 = vpop.xlane.xlu0 %438  ;;  %v678_v14 = vperm.slane %v445_v47, %v1444_v1 }
  0xa2   : > { %v675_v10 = vperm.slane %v439_v48, %v1437_v62  ;;  %v387_v48 = vadd.f32 %v1391_v30, %v1388_v29 }
  0xa4   : > { %519 = vmax.xlane.f32.xlu1 %v518_v53 }
  0xa5   : > { %528 = vmax.xlane.f32.xlu2 %v527_v61 }
  0xa6   : > { %361 = vadd.xlane.f32.xlu0 %v360_v54 }
  0xa7   : > { %v454_v6 = vpop.xlane.xlu1 %453 }
  0xa8   : > { %v683_v45 = vperm.slane %v454_v6, %v1440_v63  ;;  %v457_v46 = vpop.xlane.xlu2 %456 }
  0xa9   : > { %v442_v7 = vpop.xlane.xlu0 %441  ;;  %v685_v13 = vperm.slane %v457_v46, %v1444_v1 }
  0xaa   : > { %v676_v2 = vperm.slane %v442_v7, %v1440_v63  ;;  %v684_v11 = vsel %vm570_vm0, %v683_v45, %v682_v0 }
  0xab   : > { %v686_v12 = vsel %vm574_vm1, %v685_v13, %v684_v11 }
  0xac   : > { %v677_v55 = vsel %vm570_vm0, %v676_v2, %v675_v10  ;;  %364 = vadd.xlane.f32.xlu1 %v363_v8 }
  0xad   : > { %v679_v56 = vsel %vm574_vm1, %v678_v14, %v677_v55  ;;  %370 = vadd.xlane.f32.xlu2 %v369_v4 }
  0xae   : > { %355 = vadd.xlane.f32.xlu0 %v354_v9 }
  0xaf   : > { %v466_v59 = vpop.xlane.xlu1 %465 }
  0xb0   : > { %v690_v60 = vperm.slane %v466_v59, %v1440_v63  ;;  %v448_v16 = vpop.xlane.xlu2 %447 }
  0xb1   : > { %v463_v17 = vpop.xlane.xlu0 %462  ;;  %v680_v21 = vperm.slane %v448_v16, %v1462_v57 }
  0xb2   : > { %v689_v24 = vperm.slane %v463_v17, %v1437_v62 }
  0xb3   : > { %v681_v18 = vsel %vm578_vm2, %v680_v21, %v679_v56 }
  0xb4   : > { %v691_v23 = vsel %vm570_vm0, %v690_v60, %v689_v24  ;;  %531 = vmax.xlane.f32.xlu1 %v530_v20 }
  0xb5   : > { %367 = vadd.xlane.f32.xlu2 %v1405_v40 }
  0xb6   : > { %373 = vadd.xlane.f32.xlu0 %v372_v25 }
  0xb7   : > { %v469_v26 = vpop.xlane.xlu1 %468 }
  0xb8   : > { %v692_v33 = vperm.slane %v469_v26, %v1444_v1  ;;  %v475_v34 = vpop.xlane.xlu2 %474 }
  0xb9   : > { %v460_v35 = vpop.xlane.xlu0 %459  ;;  %v696_v40 = vperm.slane %v475_v34, %v1437_v62 }
  0xba   : > { %v687_v41 = vperm.slane %v460_v35, %v1462_v57  ;;  %v693_v42 = vsel %vm574_vm1, %v692_v33, %v691_v23 }
  0xbc   : > { %v688_v3 = vsel %vm578_vm2, %v687_v41, %v686_v12  ;;  %382 = vadd.xlane.f32.xlu1 %v1413_v44  ;;  %v378_v44 = vadd.f32 %v1375_v22, %v1372_v19  ;;  %v390_v19 = vadd.f32 %v1423_v52, %v1420_v51 }
  0xbd   : > { %v731_v5 = vsel %vm629_vm3, %v688_v3, %v681_v18  ;;  %385 = vadd.xlane.f32.xlu2 %v1417_v50 }
  0xbe   : > { %376 = vadd.xlane.f32.xlu0 %v1415_v49  ;;  %v393_v49 = vadd.f32 %v1385_v28, %v1382_v27  ;;  %v396_v27 = vadd.f32 %v1397_v32, %v1394_v31  ;;  %v399_v28 = vadd.f32 %v1429_v36, %v1426_v39  ;;  %v402_v31 = vadd.f32 %v1468_v15, %v1465_v58 }
  0xbf   : > { %v472_v43 = vpop.xlane.xlu1 %471 }
  0xc0   : > { %v694_v38 = vperm.slane %v472_v43, %v1462_v57  ;;  %v481_v37 = vpop.xlane.xlu2 %480 }
  0xc1   : > { %v478_v47 = vpop.xlane.xlu0 %477  ;;  %v699_v53 = vperm.slane %v481_v37, %v1444_v1 }
  0xc2   : > { %v697_v54 = vperm.slane %v478_v47, %v1440_v63  ;;  %v695_v50 = vsel %vm578_vm2, %v694_v38, %v693_v42 }
  0xc3   : > { %v732_v61 = vsel %vm631_vm4, %v695_v50, %v731_v5 }
  0xc4   : > { %v698_v0 = vsel %vm570_vm0, %v697_v54, %v696_v40  ;;  %388 = vadd.xlane.f32.xlu1 %v387_v48 }
  0xc5   : > { %v700_v6 = vsel %vm574_vm1, %v699_v53, %v698_v0  ;;  %394 = vadd.xlane.f32.xlu2 %v393_v49 }
  0xc6   : > { %379 = vadd.xlane.f32.xlu0 %v378_v44 }
  0xc7   : > { %v490_v29 = vpop.xlane.xlu1 %489 }
  0xc8   : > { %v704_v30 = vperm.slane %v490_v29, %v1440_v63  ;;  %v311_v46 = vpop.xlane.xlu2 %310 }
  0xc9   : > { %v487_v45 = vpop.xlane.xlu0 %486  ;;  %v405_v8 = vmul.f32 0.00390625, %v311_v46 }
  0xca   : > { %v703_v22 = vperm.slane %v487_v45, %v1437_v62 }
  0xcb   : > { %v567_v51 = vperm.slane %v405_v8, %v1437_v62 }
  0xcc   : > { %v705_v7 = vsel %vm570_vm0, %v704_v30, %v703_v22  ;;  %391 = vadd.xlane.f32.xlu1 %v390_v19 }
  0xcd   : > { %400 = vadd.xlane.f32.xlu2 %v399_v28 }
  0xce   : > { %397 = vadd.xlane.f32.xlu0 %v396_v27 }
  0xcf   : > { %v323_v9 = vpop.xlane.xlu1 %322 }
  0xd0   : > { %v409_v10 = vmul.f32 0.00390625, %v323_v9  ;;  %v326_v2 = vpop.xlane.xlu2 %325 }
  0xd1   : > { %v314_v13 = vpop.xlane.xlu0 %313  ;;  %v410_v4 = vmul.f32 0.00390625, %v326_v2 }
  0xd2   : > { %v406_v52 = vmul.f32 0.00390625, %v314_v13  ;;  %v580_v32 = vperm.slane %v409_v10, %v1437_v62 }
  0xd3   : > { %v581_v36 = vperm.slane %v410_v4, %v1440_v63 }
  0xd4   : > { %v569_v39 = vperm.slane %v406_v52, %v1440_v63 }
  0xd5   : > { %v582_v11 = vsel %vm570_vm0, %v581_v36, %v580_v32 }
  0xd6   : > { %v571_v14 = vsel %vm570_vm0, %v569_v39, %v567_v51  ;;  %403 = vadd.xlane.f32.xlu0 %v402_v31 }
  0xd7   : > { %v493_v12 = vpop.xlane.xlu1 %492 }
  0xd8   : > { %v706_v55 = vperm.slane %v493_v12, %v1444_v1  ;;  %v499_v59 = vpop.xlane.xlu2 %498  ;;  %v741_v12 = vld [vmem:[%s1676_s1 + $0x18] sm:$0xff] }
  0xd9   : > { %v484_v56 = vpop.xlane.xlu0 %483  ;;  %v710_v17 = vperm.slane %v499_v59, %v1437_v62  ;;  %935 = vmatpush.msra.mxu2 %v741_v12  ;;  %763 = vmatpush.msra.mxu0 %v741_v12 }
  0xda   : > { %v701_v60 = vperm.slane %v484_v56, %v1462_v57  ;;  %v707_v58 = vsel %vm574_vm1, %v706_v55, %v705_v7  ;;  %v740_v55 = vld [vmem:[%s1676_s1 + $0x10] sm:$0xff] }
  0xdb   : > { %936 = vmatpush.msra.mxu2 %v740_v55  ;;  %764 = vmatpush.msra.mxu0 %v740_v55 }
  0xdc   : > { %v702_v15 = vsel %vm578_vm2, %v701_v60, %v700_v6 }
  0xdd   : > { %v733_v16 = vsel %vm633_vm5, %v702_v15, %v732_v61  ;;  %v738_v15 = vld [vmem:[%s1676_s1] sm:$0xff] }
  0xdf   : > { %v317_v20 = vpop.xlane.xlu1 %316 }
  0xe0   : > { %v407_v21 = vmul.f32 0.00390625, %v317_v20  ;;  %v329_v25 = vpop.xlane.xlu2 %328 }
  0xe1   : > { %v502_v24 = vpop.xlane.xlu0 %501  ;;  %v411_v23 = vmul.f32 0.00390625, %v329_v25 }
  0xe2   : > { %v711_v18 = vperm.slane %v502_v24, %v1440_v63  ;;  %v573_v26 = vperm.slane %v407_v21, %v1444_v1 }
  0xe3   : > { %v583_v34 = vperm.slane %v411_v23, %v1444_v1 }
  0xe4   : > { %v712_v33 = vsel %vm570_vm0, %v711_v18, %v710_v17  ;;  %v575_v35 = vsel %vm574_vm1, %v573_v26, %v571_v14 }
  0xe5   : > { %v584_v41 = vsel %vm574_vm1, %v583_v34, %v582_v11 }
  0xe7   : > { %v338_v42 = vpop.xlane.xlu1 %337 }
  0xe8   : > { %v414_v3 = vmul.f32 0.00390625, %v338_v42  ;;  %v496_v40 = vpop.xlane.xlu2 %495 }
  0xe9   : > { %v335_v5 = vpop.xlane.xlu0 %334  ;;  %v708_v38 = vperm.slane %v496_v40, %v1462_v57 }
  0xea   : > { %v413_v43 = vmul.f32 0.00390625, %v335_v5  ;;  %v588_v37 = vperm.slane %v414_v3, %v1440_v63 }
  0xeb   : > { %v709_v48 = vsel %vm578_vm2, %v708_v38, %v707_v58  ;;  %v739_v58 = vld [vmem:[%s1676_s1 + $0x8] sm:$0xff] }
  0xec   : > { %v587_v47 = vperm.slane %v413_v43, %v1437_v62  ;;  %v734_v53 = vsel %vm635_vm6, %v709_v48, %v733_v16  ;;  %937 = vmatpush.msra.mxu2 %v739_v58  ;;  %765 = vmatpush.msra.mxu0 %v739_v58 }
  0xee   : > { %v589_v54 = vsel %vm570_vm0, %v588_v37, %v587_v47  ;;  %938 = vmatpush.msra.mxu2 %v738_v15  ;;  %766 = vmatpush.msra.mxu0 %v738_v15 }
  0xef   : > { %v1537_v44 = vpop.xlane.xlu1 %510 }
  0xf0   : > { %v1539_v50 = vpop.xlane.xlu2 %513  ;;  %v717_v5 = vperm.slane %v1537_v44, %v1437_v62 }
  0xf1   : > { %v505_v49 = vpop.xlane.xlu0 %504  ;;  %v718_v40 = vperm.slane %v1539_v50, %v1440_v63 }
  0xf2   : > { %v713_v8 = vperm.slane %v505_v49, %v1444_v1 }
  0xf3   : > { %v719_v49 = vsel %vm570_vm0, %v718_v40, %v717_v5 }
  0xf4   : > { %v714_v31 = vsel %vm574_vm1, %v713_v8, %v712_v33 }
  0xf7   : > { %v332_v61 = vpop.xlane.xlu1 %331 }
  0xf8   : > { %v412_v0 = vmul.f32 0.00390625, %v332_v61  ;;  %v341_v29 = vpop.xlane.xlu2 %340 }
  0xf9   : > { %v320_v6 = vpop.xlane.xlu0 %319  ;;  %v415_v45 = vmul.f32 0.00390625, %v341_v29 }
  0xfa   : > { %v408_v30 = vmul.f32 0.00390625, %v320_v6  ;;  %v585_v46 = vperm.slane %v412_v0, %v1462_v57 }
  0xfb   : > { %v590_v22 = vperm.slane %v415_v45, %v1444_v1 }
  0xfc   : > { %v577_v19 = vperm.slane %v408_v30, %v1462_v57  ;;  %v586_v27 = vsel %vm578_vm2, %v585_v46, %v584_v41 }
  0xfd   : > { %v591_v7 = vsel %vm574_vm1, %v590_v22, %v589_v54 }
  0xfe   : > { %v579_v28 = vsel %vm578_vm2, %v577_v19, %v575_v35 }
  0xff   : > { %v630_v9 = vsel %vm629_vm3, %v586_v27, %v579_v28  ;;  %v350_v10 = vpop.xlane.xlu1 %349 }
 0x100   : > { %v418_v13 = vmul.f32 0.00390625, %v350_v10  ;;  %v508_v51 = vpop.xlane.xlu2 %507 }
 0x101   : > { %v347_v2 = vpop.xlane.xlu0 %346  ;;  %v715_v4 = vperm.slane %v508_v51, %v1462_v57 }
 0x102   : > { %v417_v52 = vmul.f32 0.00390625, %v347_v2  ;;  %v595_v32 = vperm.slane %v418_v13, %v1440_v63 }
 0x103   : > { %v716_v36 = vsel %vm578_vm2, %v715_v4, %v714_v31 }
 0x104   : > { %v594_v39 = vperm.slane %v417_v52, %v1437_v62  ;;  %v735_v14 = vsel %vm637_vm7, %v716_v36, %v734_v53 }
 0x106   : > { %v596_v11 = vsel %vm570_vm0, %v595_v32, %v594_v39 }
 0x107   : > { %v523_v56 = vpop.xlane.xlu1 %522 }
 0x108   : > { %v526_v60 = vpop.xlane.xlu2 %525  ;;  %v724_v48 = vperm.slane %v523_v56, %v1437_v62 }
 0x109   : > { %v517_v59 = vpop.xlane.xlu0 %516  ;;  %v725_v53 = vperm.slane %v526_v60, %v1440_v63 }
 0x10a   : > { %v720_v38 = vperm.slane %v517_v59, %v1444_v1 }
 0x10b   : > { %v726_v30 = vsel %vm570_vm0, %v725_v53, %v724_v48 }
 0x10c   : > { %v721_v50 = vsel %vm574_vm1, %v720_v38, %v719_v49 }
 0x10f   : > { %v353_v16 = vpop.xlane.xlu1 %352 }
 0x110   : > { %v359_v20 = vpop.xlane.xlu2 %358  ;;  %v419_v34 = vmul.f32 0.00390625, %v353_v16 }
 0x111   : > { %v344_v17 = vpop.xlane.xlu0 %343  ;;  %v421_v52 = vmul.f32 0.00390625, %v359_v20 }
 0x112   : > { %v416_v21 = vmul.f32 0.00390625, %v344_v17  ;;  %v597_v41 = vperm.slane %v419_v34, %v1444_v1 }
 0x114   : > { %v592_v24 = vperm.slane %v416_v21, %v1462_v57  ;;  %v598_v54 = vsel %vm574_vm1, %v597_v41, %v596_v11 }
 0x116   : > { %v593_v25 = vsel %vm578_vm2, %v592_v24, %v591_v7 }
 0x117   : > { %v632_v18 = vsel %vm631_vm4, %v593_v25, %v630_v9  ;;  %v520_v23 = vpop.xlane.xlu1 %519 }
 0x118   : > { %v529_v33 = vpop.xlane.xlu2 %528  ;;  %v722_v37 = vperm.slane %v520_v23, %v1462_v57 }
 0x119   : > { %v362_v26 = vpop.xlane.xlu0 %361  ;;  %v727_v44 = vperm.slane %v529_v33, %v1444_v1 }
 0x11a   : > { %v723_v6 = vsel %vm578_vm2, %v722_v37, %v721_v50  ;;  %v422_v4 = vmul.f32 0.00390625, %v362_v26 }
 0x11b   : > { %v728_v22 = vsel %vm574_vm1, %v727_v44, %v726_v30  ;;  %v736_v28 = vsel %vm639_vm8, %v723_v6, %v735_v14  ;;  %v601_v14 = vperm.slane %v421_v52, %v1437_v62 }
 0x11c   : > { %v602_v21 = vperm.slane %v422_v4, %v1440_v63 }
 0x11e   : > { %v603_v40 = vsel %vm570_vm0, %v602_v21, %v601_v14 }
 0x11f   : > { %v365_v35 = vpop.xlane.xlu1 %364 }
 0x120   : > { %v371_v3 = vpop.xlane.xlu2 %370  ;;  %v423_v39 = vmul.f32 0.00390625, %v365_v35 }
 0x121   : > { %v356_v42 = vpop.xlane.xlu0 %355  ;;  %v425_v36 = vmul.f32 0.00390625, %v371_v3 }
 0x122   : > { %v420_v43 = vmul.f32 0.00390625, %v356_v42 }
 0x123   : > { %v608_v23 = vperm.slane %v425_v36, %v1437_v62 }
 0x124   : > { %v599_v47 = vperm.slane %v420_v43, %v1462_v57 }
 0x126   : > { %v600_v61 = vsel %vm578_vm2, %v599_v47, %v598_v54 }
 0x127   : > { %v1587_v0 = vsel %vm633_vm5, %v600_v61, %v632_v18  ;;  %v532_v29 = vpop.xlane.xlu1 %531  ;;  %v604_v18 = vperm.slane %v423_v39, %v1444_v1 }
 0x128   : > { %v729_v45 = vperm.slane %v532_v29, %v1462_v57  ;;  %v368_v19 = vpop.xlane.xlu2 %367 }
 0x129   : > { %v374_v46 = vpop.xlane.xlu0 %373  ;;  %v424_v55 = vmul.f32 0.00390625, %v368_v19  ;;  %v605_v37 = vsel %vm574_vm1, %v604_v18, %v603_v40 }
 0x12a   : > { %v730_v27 = vsel %vm578_vm2, %v729_v45, %v728_v22  ;;  %v426_v11 = vmul.f32 0.00390625, %v374_v46  ;;  %v777_v22 = vld [vmem:[%s1678_s3] sm:$0x3] }
 0x12b   : > { %v737_v7 = vsel %vm641_vm9, %v730_v27, %v736_v28  ;;  %v606_v33 = vperm.slane %v424_v55, %v1462_v57  ;;  %927 = vmatpush.msk.msra.mxu1 %vm786_vm11, %v777_v22 }
 0x12c   : > { %926 = vmatmul.msk.f32.vlgmr.msra.gmra.mxu2 %vm746_vm10, %v737_v7  ;;  %v609_v26 = vperm.slane %v426_v11, %v1440_v63 }
 0x12d   : > { %v607_v48 = vsel %vm578_vm2, %v606_v33, %v605_v37 }
 0x12e   : > { %v610_v47 = vsel %vm570_vm0, %v609_v26, %v608_v23  ;;  %v636_v29 = vsel %vm635_vm6, %v607_v48, %v1587_v0 }
 0x12f   : > { %v383_v8 = vpop.xlane.xlu1 %382 }
 0x130   : > { %v386_v10 = vpop.xlane.xlu2 %385  ;;  %v429_v31 = vmul.f32 0.00390625, %v383_v8 }
 0x131   : > { %v377_v9 = vpop.xlane.xlu0 %376  ;;  %v430_v32 = vmul.f32 0.00390625, %v386_v10 }
 0x132   : > { %v427_v56 = vmul.f32 0.00390625, %v377_v9  ;;  %v615_v20 = vperm.slane %v429_v31, %v1437_v62 }
 0x133   : > { %v616_v24 = vperm.slane %v430_v32, %v1440_v63 }
 0x134   : > { %v611_v34 = vperm.slane %v427_v56, %v1444_v1 }
 0x135   : > { %v617_v43 = vsel %vm570_vm0, %v616_v24, %v615_v20 }
 0x136   : > { %v612_v53 = vsel %vm574_vm1, %v611_v34, %v610_v47 }
 0x137   : > { %v389_v13 = vpop.xlane.xlu1 %388 }
 0x138   : > { %v395_v51 = vpop.xlane.xlu2 %394  ;;  %v431_v60 = vmul.f32 0.00390625, %v389_v13  ;;  %v988_v13 = vld [vmem:[%s1679_s4] ss:$0 sm:$0xff] }
 0x139   : > { %v380_v2 = vpop.xlane.xlu0 %379  ;;  %v433_v15 = vmul.f32 0.00390625, %v395_v51 }
 0x13a   : > { %v428_v58 = vmul.f32 0.00390625, %v380_v2  ;;  %v618_v41 = vperm.slane %v431_v60, %v1444_v1 }
 0x13b   : > { %v622_v3 = vperm.slane %v433_v15, %v1437_v62 }
 0x13c   : > { %v613_v42 = vperm.slane %v428_v58, %v1462_v57  ;;  %v619_v62 = vsel %vm574_vm1, %v618_v41, %v617_v43 }
 0x13f   : > { %v392_v12 = vpop.xlane.xlu1 %391 }
 0x140   : > { %v401_v17 = vpop.xlane.xlu2 %400  ;;  %v432_v25 = vmul.f32 0.00390625, %v392_v12 }
 0x141   : > { %v398_v59 = vpop.xlane.xlu0 %397  ;;  %v435_v35 = vmul.f32 0.00390625, %v401_v17 }
 0x142   : > { %v434_v16 = vmul.f32 0.00390625, %v398_v59  ;;  %v620_v38 = vperm.slane %v432_v25, %v1462_v57 }
 0x143   : > { %v625_v54 = vperm.slane %v435_v35, %v1444_v1 }
 0x144   : > { %v623_v5 = vperm.slane %v434_v16, %v1440_v63  ;;  %v614_v63 = vsel %vm578_vm2, %v613_v42, %v612_v53  ;;  %v621_v50 = vsel %vm578_vm2, %v620_v38, %v619_v62 }
 0x145   : > { %v638_v45 = vsel %vm637_vm7, %v614_v63, %v636_v29 }
 0x146   : > { %v624_v44 = vsel %vm570_vm0, %v623_v5, %v622_v3  ;;  %v640_v46 = vsel %vm639_vm8, %v621_v50, %v638_v45 }
 0x147   : > { %v626_v30 = vsel %vm574_vm1, %v625_v54, %v624_v44 }
 0x149   : > { %v404_v49 = vpop.xlane.xlu0 %403 }
 0x14a   : > { %v436_v61 = vmul.f32 0.00390625, %v404_v49 }
 0x14c   : > { %v627_v6 = vperm.slane %v436_v61, %v1462_v57  ;;  %v987_v57 = vld [vmem:[%s1677_s2] ss:$0 sm:$0xff] }
 0x14e   : > { %v628_v1 = vsel %vm578_vm2, %v627_v6, %v626_v30 }
 0x14f   : > { %v642_v19 = vsel %vm641_vm9, %v628_v1, %v640_v46 }
 0x150   : > { %925 = vmatmul.msk.f32.vlgmr.msra.gmra.mxu0 %vm746_vm10, %v642_v19 }
 0x1af   : > { %v771_v0 = vpop.f32.mrf.mxu2 }
 0x1b0   : > { %v772_v27 = vadd.f32 %v987_v57, %v771_v0 }
 0x1b2   : > { %v775_v8 = vmax.f32 %v772_v27, 0.0 }
 0x1cd   : > { %v768_v28 = vpop.f32.mrf.mxu0 }
 0x1ce   : > { %v769_v7 = vadd.f32 %v987_v57, %v768_v28 }
 0x1d0   : > { %v774_v9 = vmax.f32 %v769_v7, 0.0 }
 0x1d2   : > { %v776_v10 = vadd.f32 %v775_v8, %v774_v9 }
 0x1d4   : > { %928 = vmatmul.msk.f32.vlgmr.msra.gmra.mxu1 %vm782_vm12, %v776_v10 }
 0x251   : > { %v807_v2 = vpop.f32.mrf.mxu1 }
 0x252   : > { %v808_v51 = vadd.f32 %v988_v13, %v807_v2 }
 0x254   : > { %v929_v52 = vmul.f32 -1.442695, %v808_v51 }
 0x256   : > { %989 = vpow2.f32 %v929_v52 }
 0x25c   : > { %v990_v4 = vpop.eup %989 }
 0x25d   : > { %v813_v31 = vadd.f32 1.0, %v990_v4 }
 0x25f   : > { %991 = vrcp.f32 %v813_v31  ;;  %v825_v11 = vand.u32 2147483648, %v813_v31  ;;  %v823_v14 = vand.u32 2147483647, %v813_v31  ;;  %vm819_vm14 = vweird.f32 %v813_v31 }
 0x261   : > { %v826_v56 = vor.u32 1.1754944e-38, %v825_v11  ;;  %vm824_vm0 = vcmp.eq.f32.partialorder %v823_v14, 8.507059e+37 }
 0x265   : > { %v992_v32 = vpop.eup %991 }
 0x266   : > { %v815_v39 = vmul.f32 %v992_v32, %v813_v31  ;;  %vm820_vm13 = vweird.f32 %v992_v32 }
 0x267   : > { %vm821_vm15 = vmor %vm819_vm14, %vm820_vm13 }
 0x268   : > { %v816_v36 = vsub.f32 1.0, %v815_v39 }
 0x26a   : > { %v817_v12 = vmul.f32 %v992_v32, %v816_v36 }
 0x26c   : > { %v818_v55 = vadd.f32 %v992_v32, %v817_v12 }
 0x26e   : > { %v822_v59 = vsel %vm821_vm15, %v992_v32, %v818_v55 }
 0x26f   : > { %v827_v60 = vsel %vm824_vm0, %v826_v56, %v822_v59 }
 0x270   : > { %829 = vst.msk [vmem:[%s244_s17] sm:$0xff] %vm746_vm10, %v827_v60 }
 0x271   : > { %1050 = shalt.err (!%p1047_p4)
}
 0x272   : > { %941 = dma.vmem_to_hbm [thread:$0]  (%p1173_p11), %s844_s26, 128, %s846_s8, %s831_s22  }
 0x273 PF: > { %s857_s12 = sand.u32 1, %s1077_s18   ;;  %p1686_p7 = scmp.ge.s32.totalorder %s1089_s21, 2 }
 0x274   : > { %s858_s25 = scalar_lea.sflag [#allocation4], %s857_s12 }
 0x275   : > { %p948_p5 = pnand %p1686_p7, %p1177_p12 }
 0x277   : > { %p949_p8 = pneg %p948_p5 }
 0x279   : > { %1072 = dma.done.wait (%p949_p8), %s858_s25, 128  }
 0x27a   : > { %1074 = vsyncadd (%p949_p8), %s858_s25, 4294967168  ;;  %p18_p10 = scmp.ge.s32.totalorder %s1148_s24, 4   ;;  %s1687_s18 = smov %s1081_s19 }
 0x27b   : > { %s1688_s19 = smov %s1085_s20  ;;  %s1689_s20 = smov %s1160_s27 }
 0x27c   : > { %s1690_s21 = smov %s1148_s24  ;;  %20 = sbr.rel (!%p18_p10) target bundleno = 5 (0x5), region = 85 }
 0x281   :  { %864 = vsyncpa [#allocation3], 1 }
 0x282   :  { %866 = vsyncpa [#allocation3 + $0x1], 1 }
 0x283   :  { %867 = vsyncpa [#allocation4], 1 }
 0x284   :  { %869 = vsyncpa [#allocation4 + $0x1], 1 }

</bundles_post_ra>
